<compile_context>
chip_gen: v7x
topology: tpu7x:2x2x1
jax: 0.10.0
libtpu: 0.0.40
codegen_flags: <defaults>
</compile_context>

<pallas_src>
import functools

import jax
import jax.numpy as jnp
from jax.experimental import pallas as pl
from jax.experimental.pallas import tpu as pltpu

IGNORE_INDEX = -100
_LANE = 128


def _vmem_capacity_bytes():
    """Per-core VMEM capacity; conservative (v7x-sized) fallback if unavailable."""
    try:
        cap = getattr(pltpu.get_tpu_info(), "vmem_capacity_bytes", None)
        if cap:
            return int(cap)
    except Exception:
        pass
    return 64 << 20


def _choose_tiles(n_tokens, n_classes, itemsize, vmem_budget):
    """Pick (tile_n, tile_c) so the whole double-buffered working set fits VMEM.

    Accounts for: 2 logits buffers, 2 label buffers, 2 per-token-loss output
    buffers and 3 f32 accumulators — the narrow (tile_n, 1) buffers are
    lane-padded to 128 words, i.e. ~512 B per row each.
    """
    sublane = max(8, 32 // itemsize)              # f32: 8, bf16: 16, int8/fp8: 32
    n_buf = 2
    per_row_narrow = (2 + 2 + 3) * _LANE * 4      # labels(2) + loss out(2) + 3 accs

    # --- class chunk (reduction axis, last grid dim) ---
    row_floor = max(1, min(n_tokens, 256))        # keep at least this many rows
    max_c_bytes = max(vmem_budget // row_floor - per_row_narrow,
                      n_buf * itemsize * _LANE)
    max_c = max(_LANE, (max_c_bytes // (n_buf * itemsize)) // _LANE * _LANE)
    c_cap = 8192
    if n_classes <= min(max_c, c_cap):
        tile_c = n_classes                        # full class dim: always legal
    else:
        tile_c = min(max_c, c_cap)                # multiple of 128; tail masked

    # --- row tile ---
    per_row = n_buf * tile_c * itemsize + per_row_narrow
    tile_n = vmem_budget // per_row
    step_cap = (16 << 20) // max(tile_c * itemsize, 1)   # <=16 MiB logits per step
    tile_n = min(tile_n, step_cap, 8192)
    tile_n = max(sublane, (tile_n // sublane) * sublane)
    if n_tokens <= tile_n:
        tile_n = n_tokens                         # full token dim: always legal
    return tile_n, tile_c


def _ce_kernel(logits_ref, labels_ref, loss_ref, m_acc, l_acc, pick_acc,
               *, n_tokens, n_classes, tile_n, tile_c, n_chunks, ignore_index):
    """Streaming cross-entropy with online logsumexp over class chunks.

    logits_ref: (tile_n, tile_c) logits chunk (native dtype, upcast in-kernel)
    labels_ref: (tile_n, 1) int32 labels for this row tile
    loss_ref:   (tile_n, 1) f32 per-token loss output (written at last chunk)
    m_acc/l_acc/pick_acc: (tile_n, 1) f32 online-LSE / target-logit state
    """
    i = pl.program_id(0)            # row-tile index (token axis, "parallel")
    j = pl.program_id(1)            # class-chunk index (reduction axis, last)
    last_j = n_chunks - 1

    @pl.when(j == 0)
    def _():
        m_acc[...] = jnp.full_like(m_acc, -jnp.inf)
        l_acc[...] = jnp.zeros_like(l_acc)
        pick_acc[...] = jnp.zeros_like(pick_acc)

    x = logits_ref[...].astype(jnp.float32)          # (tile_n, tile_c)
    t = labels_ref[...]                              # (tile_n, 1) int32

    # Chunk-local class indices (no per-element "+ j*tile_c" add).
    col = jax.lax.broadcasted_iota(jnp.int32, x.shape, 1)

    def lse_update(x_lse):
        m_chunk = jnp.max(x_lse, axis=-1, keepdims=True)         # (tile_n, 1)
        m_new = jnp.maximum(m_acc[...], m_chunk)
        l_acc[...] = (jnp.exp(m_acc[...] - m_new) * l_acc[...]
                      + jnp.sum(jnp.exp(x_lse - m_new), axis=-1, keepdims=True))
        m_acc[...] = m_new

    if n_classes % tile_c != 0:
        # Class-tail garbage columns exist only in the last chunk; mask them
        # there (select with -inf, so NaN/Inf padding can't leak) and keep all
        # other chunks on the cheap, mask-free path.
        tail = n_classes - last_j * tile_c           # static, in [1, tile_c)

        @pl.when(j < last_j)
        def _():
            lse_update(x)

        @pl.when(j == last_j)
        def _():
            lse_update(jnp.where(col < tail, x, -jnp.inf))
    else:
        lse_update(x)

    # Accumulate the target-class logit (iota == label match; no dynamic gather).
    # Offset is folded into the (tile_n, 1) label instead of the (tile_n, tile_c) iota.
    t_local = t - j * tile_c
    pick_acc[...] += jnp.sum(jnp.where(col == t_local, x, 0.0),
                             axis=-1, keepdims=True)

    @pl.when(j == last_j)
    def _():
        valid = t != ignore_index                                # (tile_n, 1) bool
        if n_tokens % tile_n != 0:
            row = i * tile_n + jax.lax.broadcasted_iota(jnp.int32, (tile_n, 1), 0)
            valid = jnp.logical_and(valid, row < n_tokens)       # mask row-tail garbage
        lse = m_acc[...] + jnp.log(l_acc[...])
        loss_ref[...] = jnp.where(valid, lse - pick_acc[...], 0.0)


def cross_entropy_loss(pred, target, *, ignore_index=IGNORE_INDEX, tiles=None):
    """JAX/Pallas equivalent of the PyTorch CrossEntropyLoss module's forward.

    pred:   (B, L, C) float logits (any float dtype; bf16 stays bf16 on the wire)
    target: (B, L) int labels (ignore_index marks ignored positions)
    Returns scalar float32 mean cross-entropy over non-ignored tokens.
    (If every token is ignored the result is NaN, matching PyTorch.)
    """
    B, L, C = pred.shape
    N = B * L
    logits = pred.reshape(N, C)                      # no dtype cast, no padding copy
    labels = target.reshape(N, 1).astype(jnp.int32)

    vmem_cap = _vmem_capacity_bytes()
    vmem_limit = int(vmem_cap * 0.8)                 # ~51 MiB on v7x, ~102 MiB v5e/v6e
    vmem_budget = vmem_limit - (4 << 20)             # compiler slack

    if tiles is None:
        tile_n, tile_c = _choose_tiles(N, C, jnp.dtype(logits.dtype).itemsize,
                                       vmem_budget)
    else:
        tile_n, tile_c = tiles                       # test hook (tail-path coverage)
    n_row_tiles = pl.cdiv(N, tile_n)
    n_chunks = pl.cdiv(C, tile_c)

    kernel = functools.partial(
        _ce_kernel, n_tokens=N, n_classes=C,
        tile_n=tile_n, tile_c=tile_c, n_chunks=n_chunks, ignore_index=ignore_index)

    # TODO(synk): optional per-class `weight` tensor not implemented (module default is None).
    # TODO(synk): lane-folding for C < 128 (pack several rows across lanes) not implemented.
    # TODO(synk): pipeline_mode=pl.Buffered(3) on the logits spec is a possible further
    #             few-% win when VMEM headroom allows; kept at default double-buffering.
    per_token = pl.pallas_call(
        kernel,
        out_shape=jax.ShapeDtypeStruct((N, 1), jnp.float32),
        grid_spec=pltpu.PrefetchScalarGridSpec(
            num_scalar_prefetch=0,
            grid=(n_row_tiles, n_chunks),
            in_specs=[
                pl.BlockSpec((tile_n, tile_c), lambda i, j: (i, j)),
                pl.BlockSpec((tile_n, 1), lambda i, j: (i, 0)),
            ],
            out_specs=pl.BlockSpec((tile_n, 1), lambda i, j: (i, 0)),
            scratch_shapes=[
                pltpu.VMEM((tile_n, 1), jnp.float32),   # m_acc (running max)
                pltpu.VMEM((tile_n, 1), jnp.float32),   # l_acc (running sum-exp)
                pltpu.VMEM((tile_n, 1), jnp.float32),   # pick_acc (target logit)
            ],
        ),
        compiler_params=pltpu.CompilerParams(
            dimension_semantics=("parallel", "arbitrary"),
            vmem_limit_bytes=vmem_limit,
        ),
    )(logits, labels)

    # reduction='mean' with ignore_index: sum of losses / number of valid tokens.
    valid_cnt = jnp.sum((target.reshape(-1) != ignore_index).astype(jnp.float32))
    return (jnp.sum(per_token) / valid_cnt).astype(jnp.float32)


def _reference(pred, target, ignore_index=IGNORE_INDEX):
    """Pure-JAX reference for sanity checking."""
    B, L, C = pred.shape
    x = pred.reshape(B * L, C).astype(jnp.float32)
    t = target.reshape(B * L)
    lse = jax.nn.logsumexp(x, axis=-1)
    picked = jnp.take_along_axis(x, jnp.clip(t, 0, C - 1)[:, None], axis=-1)[:, 0]
    valid = t != ignore_index
    per_tok = jnp.where(valid, lse - picked, 0.0)
    return jnp.sum(per_tok) / jnp.sum(valid.astype(jnp.float32))


if __name__ == "__main__":
    key = jax.random.PRNGKey(0)
    k1, k2, k3, k4 = jax.random.split(key, 4)

    # Small demo shapes consistent with the module: (B, L, C) logits, (B, L) labels.
    B, L, C = 2, 8, 32
    pred = jax.random.normal(k1, (B, L, C), dtype=jnp.float32)
    target = jax.random.randint(k2, (B, L), 0, C, dtype=jnp.int32)
    target = target.at[0, 0].set(IGNORE_INDEX)
    target = target.at[1, 3].set(IGNORE_INDEX)

    loss = cross_entropy_loss(pred, target)
    jax.block_until_ready(loss)
    ref = _reference(pred, target)
    assert jnp.allclose(loss, ref, rtol=1e-5, atol=1e-5), (loss, ref)

    # A second small shape with more classes / ignored rows for extra coverage.
    B2, L2, C2 = 2, 36, 160
    pred2 = jax.random.normal(k3, (B2, L2, C2), dtype=jnp.float32)
    target2 = jax.random.randint(k4, (B2, L2), 0, C2, dtype=jnp.int32)
    target2 = target2.at[0, :5].set(IGNORE_INDEX)
    loss2 = cross_entropy_loss(pred2, target2)
    jax.block_until_ready(loss2)
    ref2 = _reference(pred2, target2)
    assert jnp.allclose(loss2, ref2, rtol=1e-5, atol=1e-5), (loss2, ref2)

    # Same inputs but forced small tiles: exercises the multi-chunk online-LSE,
    # the class-tail -inf mask on the last chunk, and the row-tail mask.
    loss3 = cross_entropy_loss(pred2, target2, tiles=(32, 128))
    jax.block_until_ready(loss3)
    assert jnp.allclose(loss3, ref2, rtol=1e-5, atol=1e-5), (loss3, ref2)

    print("KERNEL_OK")
</pallas_src>

<mosaic_0001>
module attributes {stable_mosaic.version = 11 : i64} {
  func.func @_ce_kernel(%arg0: i32, %arg1: i32, %arg2: memref<16x32xf32, #tpu.memory_space<vmem>>, %arg3: memref<16x1xi32, #tpu.memory_space<vmem>>, %arg4: memref<16x1xf32, #tpu.memory_space<vmem>>, %arg5: memref<16x1xf32, #tpu.memory_space<vmem>>, %arg6: memref<16x1xf32, #tpu.memory_space<vmem>>, %arg7: memref<16x1xf32, #tpu.memory_space<vmem>>) attributes {dimension_semantics = [#tpu.dimension_semantics<parallel>, #tpu.dimension_semantics<arbitrary>], iteration_bounds = array<i64: 1, 1>, scalar_prefetch = 0 : i64, scratch_operands = 3 : i64, tpu.core_type = #tpu.core_type<tc>, window_params = [{transform_indices = @transform_0, window_bounds = array<i64: 16, 32>}, {transform_indices = @transform_1, window_bounds = array<i64: 16, 1>}, {transform_indices = @transform_2, window_bounds = array<i64: 16, 1>}]} {
    %c0_i32 = arith.constant 0 : i32
    %0 = arith.cmpi eq, %arg1, %c0_i32 : i32
    %1 = arith.extui %0 : i1 to i32
    %c0_i32_0 = arith.constant 0 : i32
    %2 = arith.cmpi ne, %1, %c0_i32_0 : i32
    scf.if %2 {
      %cst_23 = arith.constant 0xFF800000 : f32
      %38 = vector.broadcast %cst_23 : f32 to vector<16x1xf32>
      %c0_24 = arith.constant 0 : index
      %c0_25 = arith.constant 0 : index
      %39 = vector.load %arg5[%c0_24, %c0_25] : memref<16x1xf32, #tpu.memory_space<vmem>>, vector<16x1xf32>
      tpu.vector_store %arg5[%c0_24, %c0_25], %38 {strides = array<i32>} : memref<16x1xf32, #tpu.memory_space<vmem>>, vector<16x1xf32>,
      %cst_26 = arith.constant 0.000000e+00 : f32
      %40 = vector.broadcast %cst_26 : f32 to vector<16x1xf32>
      %c0_27 = arith.constant 0 : index
      %c0_28 = arith.constant 0 : index
      %41 = vector.load %arg6[%c0_27, %c0_28] : memref<16x1xf32, #tpu.memory_space<vmem>>, vector<16x1xf32>
      tpu.vector_store %arg6[%c0_27, %c0_28], %40 {strides = array<i32>} : memref<16x1xf32, #tpu.memory_space<vmem>>, vector<16x1xf32>,
      %cst_29 = arith.constant 0.000000e+00 : f32
      %42 = vector.broadcast %cst_29 : f32 to vector<16x1xf32>
      %c0_30 = arith.constant 0 : index
      %c0_31 = arith.constant 0 : index
      %43 = vector.load %arg7[%c0_30, %c0_31] : memref<16x1xf32, #tpu.memory_space<vmem>>, vector<16x1xf32>
      tpu.vector_store %arg7[%c0_30, %c0_31], %42 {strides = array<i32>} : memref<16x1xf32, #tpu.memory_space<vmem>>, vector<16x1xf32>,
    } else {
    }
    %c0 = arith.constant 0 : index
    %c0_1 = arith.constant 0 : index
    %3 = vector.load %arg2[%c0, %c0_1] : memref<16x32xf32, #tpu.memory_space<vmem>>, vector<16x32xf32>
    %c0_2 = arith.constant 0 : index
    %c0_3 = arith.constant 0 : index
    %4 = vector.load %arg3[%c0_2, %c0_3] : memref<16x1xi32, #tpu.memory_space<vmem>>, vector<16x1xi32>
    %5 = tpu.iota {dimensions = array<i32: 1>} : vector<16x32xi32>
    %cst = arith.constant dense<0xFF800000> : vector<16xf32>
    %6 = vector.multi_reduction <maximumf>, %3, %cst [1] : vector<16x32xf32> to vector<16xf32>
    %7 = vector.shape_cast %6 : vector<16xf32> to vector<16x1xf32>
    %c0_4 = arith.constant 0 : index
    %c0_5 = arith.constant 0 : index
    %8 = vector.load %arg5[%c0_4, %c0_5] : memref<16x1xf32, #tpu.memory_space<vmem>>, vector<16x1xf32>
    %9 = arith.maximumf %8, %7 : vector<16x1xf32>
    %c0_6 = arith.constant 0 : index
    %c0_7 = arith.constant 0 : index
    %10 = vector.load %arg5[%c0_6, %c0_7] : memref<16x1xf32, #tpu.memory_space<vmem>>, vector<16x1xf32>
    %11 = arith.subf %10, %9 : vector<16x1xf32>
    %12 = math.exp %11 : vector<16x1xf32>
    %c0_8 = arith.constant 0 : index
    %c0_9 = arith.constant 0 : index
    %13 = vector.load %arg6[%c0_8, %c0_9] : memref<16x1xf32, #tpu.memory_space<vmem>>, vector<16x1xf32>
    %14 = arith.mulf %12, %13 : vector<16x1xf32>
    %15 = vector.broadcast %9 : vector<16x1xf32> to vector<16x32xf32>
    %16 = arith.subf %3, %15 : vector<16x32xf32>
    %17 = math.exp %16 : vector<16x32xf32>
    %cst_10 = arith.constant dense<0.000000e+00> : vector<16xf32>
    %18 = vector.multi_reduction <add>, %17, %cst_10 [1] : vector<16x32xf32> to vector<16xf32>
    %19 = vector.shape_cast %18 : vector<16xf32> to vector<16x1xf32>
    %20 = arith.addf %14, %19 : vector<16x1xf32>
    %c0_11 = arith.constant 0 : index
    %c0_12 = arith.constant 0 : index
    %21 = vector.load %arg6[%c0_11, %c0_12] : memref<16x1xf32, #tpu.memory_space<vmem>>, vector<16x1xf32>
    tpu.vector_store %arg6[%c0_11, %c0_12], %20 {strides = array<i32>} : memref<16x1xf32, #tpu.memory_space<vmem>>, vector<16x1xf32>,
    %c0_13 = arith.constant 0 : index
    %c0_14 = arith.constant 0 : index
    %22 = vector.load %arg5[%c0_13, %c0_14] : memref<16x1xf32, #tpu.memory_space<vmem>>, vector<16x1xf32>
    tpu.vector_store %arg5[%c0_13, %c0_14], %9 {strides = array<i32>} : memref<16x1xf32, #tpu.memory_space<vmem>>, vector<16x1xf32>,
    %c32_i32 = arith.constant 32 : i32
    %23 = arith.muli %arg1, %c32_i32 : i32
    %24 = vector.broadcast %23 : i32 to vector<16x1xi32>
    %25 = arith.subi %4, %24 : vector<16x1xi32>
    %c0_15 = arith.constant 0 : index
    %c0_16 = arith.constant 0 : index
    %26 = vector.load %arg7[%c0_15, %c0_16] : memref<16x1xf32, #tpu.memory_space<vmem>>, vector<16x1xf32>
    %27 = vector.broadcast %25 : vector<16x1xi32> to vector<16x32xi32>
    %28 = arith.cmpi eq, %5, %27 : vector<16x32xi32>
    %cst_17 = arith.constant 0.000000e+00 : f32
    %29 = vector.broadcast %cst_17 : f32 to vector<16x32xf32>
    %30 = arith.select %28, %3, %29 : vector<16x32xi1>, vector<16x32xf32>
    %cst_18 = arith.constant dense<0.000000e+00> : vector<16xf32>
    %31 = vector.multi_reduction <add>, %30, %cst_18 [1] : vector<16x32xf32> to vector<16xf32>
    %32 = vector.shape_cast %31 : vector<16xf32> to vector<16x1xf32>
    %33 = arith.addf %26, %32 : vector<16x1xf32>
    %c0_19 = arith.constant 0 : index
    %c0_20 = arith.constant 0 : index
    %34 = vector.load %arg7[%c0_19, %c0_20] : memref<16x1xf32, #tpu.memory_space<vmem>>, vector<16x1xf32>
    tpu.vector_store %arg7[%c0_19, %c0_20], %33 {strides = array<i32>} : memref<16x1xf32, #tpu.memory_space<vmem>>, vector<16x1xf32>,
    %c0_i32_21 = arith.constant 0 : i32
    %35 = arith.cmpi eq, %arg1, %c0_i32_21 : i32
    %36 = arith.extui %35 : i1 to i32
    %c0_i32_22 = arith.constant 0 : i32
    %37 = arith.cmpi ne, %36, %c0_i32_22 : i32
    scf.if %37 {
      %c-100_i32 = arith.constant -100 : i32
      %38 = vector.broadcast %c-100_i32 : i32 to vector<16x1xi32>
      %39 = arith.cmpi ne, %4, %38 : vector<16x1xi32>
      %c0_23 = arith.constant 0 : index
      %c0_24 = arith.constant 0 : index
      %40 = vector.load %arg5[%c0_23, %c0_24] : memref<16x1xf32, #tpu.memory_space<vmem>>, vector<16x1xf32>
      %c0_25 = arith.constant 0 : index
      %c0_26 = arith.constant 0 : index
      %41 = vector.load %arg6[%c0_25, %c0_26] : memref<16x1xf32, #tpu.memory_space<vmem>>, vector<16x1xf32>
      %42 = math.log %41 : vector<16x1xf32>
      %43 = arith.addf %40, %42 : vector<16x1xf32>
      %c0_27 = arith.constant 0 : index
      %c0_28 = arith.constant 0 : index
      %44 = vector.load %arg7[%c0_27, %c0_28] : memref<16x1xf32, #tpu.memory_space<vmem>>, vector<16x1xf32>
      %45 = arith.subf %43, %44 : vector<16x1xf32>
      %cst_29 = arith.constant 0.000000e+00 : f32
      %46 = vector.broadcast %cst_29 : f32 to vector<16x1xf32>
      %47 = arith.select %39, %45, %46 : vector<16x1xi1>, vector<16x1xf32>
      %c0_30 = arith.constant 0 : index
      %c0_31 = arith.constant 0 : index
      %48 = vector.load %arg4[%c0_30, %c0_31] : memref<16x1xf32, #tpu.memory_space<vmem>>, vector<16x1xf32>
      tpu.vector_store %arg4[%c0_30, %c0_31], %47 {strides = array<i32>} : memref<16x1xf32, #tpu.memory_space<vmem>>, vector<16x1xf32>,
    } else {
    }
    return
  }
  func.func @transform_0(%arg0: i32, %arg1: i32) -> (i32, i32) {
    %c0_i32 = arith.constant 0 : i32
    return %arg0, %arg1 : i32, i32
  }
  func.func @transform_1(%arg0: i32, %arg1: i32) -> (i32, i32) {
    %c0_i32 = arith.constant 0 : i32
    %c0_i32_0 = arith.constant 0 : i32
    return %arg0, %c0_i32 : i32, i32
  }
  func.func @transform_2(%arg0: i32, %arg1: i32) -> (i32, i32) {
    %c0_i32 = arith.constant 0 : i32
    %c0_i32_0 = arith.constant 0 : i32
    return %arg0, %c0_i32 : i32, i32
  }
}

</mosaic_0001>

<bundles_post_ra>
// kernel: tpu_custom_call.1
= control target key start
LH: loop header
LB: loop body
LE: loop exit
PB: predicated region body
PF: predicated region fallthrough
CT: control target
= control target key end

     0   :  { %vm28_vm0 = vcmask 261120   ;;  %vm15_vm1 = vcmask 7168   ;;  %v148_v2 = vmov -inf   ;;  %v149_v5 = vmov 0   ;;  %s212_s0 = inlined_call_operand.vmem [shape: f32[16,32], index: 0, kind: input, shape index: {}]   ;;  %s213_s1 = inlined_call_operand.vmem [shape: s32[16,1], index: 1, kind: input, shape index: {}]   ;;  %s214_s2 = inlined_call_operand.vmem [shape: f32[16,1], index: 2, kind: output, shape index: {}]  }
   0x1   :  { %v22_v0 = vld [vmem:[%s212_s0] sm:$0xff]  ;;  %v23_v1 = vld [vmem:[%s212_s0 + $0x8] sm:$0xff]  ;;  %16 = vst.msk [vmem:[#allocation2] sm:$0xff] %vm15_vm1, %v148_v2  ;;  %17 = vst.msk [vmem:[#allocation2 + $0x8] sm:$0xff] %vm15_vm1, %v148_v2  ;;  %134 = vset.pattern.permute.xlu1 %v149_v5  ;;  %135 = vset.pattern.permute.xlu0 %v149_v5  ;;  %v150_v6 = vmov 0.0   ;;  %v26_v17 = vlaneseq }
   0x2   :  { %v29_v3 = vsel %vm28_vm0, %v22_v0, -inf  ;;  %v32_v4 = vsel %vm28_vm0, %v23_v1, -inf  ;;  %18 = vst.msk [vmem:[#allocation3] sm:$0xff] %vm15_vm1, %v150_v6  ;;  %19 = vst.msk [vmem:[#allocation3 + $0x8] sm:$0xff] %vm15_vm1, %v150_v6  ;;  %v183_v7 = vld [vmem:[%s213_s1] sm:$0xff]  ;;  %v191_v16 = vld [vmem:[%s213_s1 + $0x8] sm:$0xff] }
   0x3   :  { %30 = vmax.xlane.f32.xlu0 %v29_v3  ;;  %20 = vst.msk [vmem:[#allocation4] sm:$0xff] %vm15_vm1, %v150_v6  ;;  %21 = vst.msk [vmem:[#allocation4 + $0x8] sm:$0xff] %vm15_vm1, %v150_v6  ;;  %v27_v18 = vand.u32 127, %v26_v17  ;;  %vm107_vm4 = vcmp.ne.s32.totalorder %v183_v7, 4294967196  ;;  %vm108_vm5 = vcmp.ne.s32.totalorder %v191_v16, 4294967196 }
   0x7   :  { %33 = vmax.xlane.f32.xlu0 %v32_v4 }
   0x8   :  { %v35_v8 = vld [vmem:[#allocation2] sm:$0xff]  ;;  %v36_v11 = vld [vmem:[#allocation2 + $0x8] sm:$0xff] }
   0x9   :  { %v45_v41 = vld [vmem:[#allocation3] sm:$0xff]  ;;  %v46_v45 = vld [vmem:[#allocation3 + $0x8] sm:$0xff] }
   0xa   :  { %v82_v35 = vld [vmem:[#allocation4] sm:$0xff]  ;;  %v83_v50 = vld [vmem:[#allocation4 + $0x8] sm:$0xff] }
  0x1d   :  { %85 = vperm.xlu0 %135, %v183_v7  }
  0x90   :  { %v31_v9 = vpop.xlane.xlu0 %30 }
  0x91   :  { %v37_v10 = vmax.f32 %v35_v8, %v31_v9 }
  0x93   :  { %v39_v12 = vsub.f32 %v35_v8, %v37_v10  ;;  %76 = vst.msk [vmem:[#allocation2] sm:$0xff] %vm15_vm1, %v37_v10  ;;  %51 = vperm.xlu1 %134, %v37_v10  }
  0x94   :  { %v34_v13 = vpop.xlane.xlu0 %33 }
  0x95   :  { %v38_v14 = vmax.f32 %v36_v11, %v34_v13  ;;  %v41_v38 = vmul.f32 1.442695, %v39_v12 }
  0x97   :  { %v40_v15 = vsub.f32 %v36_v11, %v38_v14  ;;  %77 = vst.msk [vmem:[#allocation2 + $0x8] sm:$0xff] %vm15_vm1, %v38_v14  ;;  %56 = vperm.xlu1 %134, %v38_v14  }
  0x99   :  { %v43_v39 = vmul.f32 1.442695, %v40_v15 }
  0x9a   :  { %v109_v57 = vld [vmem:[#allocation2] sm:$0xff] }
  0x9b   :  { %88 = vperm.xlu1 %134, %v191_v16  }
  0x9c   :  { %v86_v19 = vpop.permute.xlu0 %85 }
  0x9d   :  { %vm90_vm2 = vcmp.eq.s32.totalorder %v27_v18, %v86_v19 }
  0x9e   :  { %v92_v20 = vsel %vm90_vm2, %v22_v0, 0.0  ;;  %v110_v63 = vld [vmem:[#allocation2 + $0x8] sm:$0xff] }
  0x9f   :  { %v94_v21 = vsel %vm28_vm0, %v92_v20, 0.0 }
  0xa0   :  { %95 = vadd.xlane.f32.xlu0 %v94_v21 }
 0x112   :  { %v52_v22 = vpop.permute.xlu1 %51 }
 0x113   :  { %v59_v23 = vsub.f32 %v22_v0, %v52_v22 }
 0x115   :  { %v61_v24 = vmul.f32 1.442695, %v59_v23 }
 0x116   :  { %v57_v25 = vpop.permute.xlu1 %56 }
 0x117   :  { %136 = vpow2.f32 %v61_v24  ;;  %v60_v26 = vsub.f32 %v23_v1, %v57_v25 }
 0x119   :  { %v63_v27 = vmul.f32 1.442695, %v60_v26 }
 0x11a   :  { %v89_v29 = vpop.permute.xlu1 %88 }
 0x11b   :  { %138 = vpow2.f32 %v63_v27  ;;  %vm91_vm3 = vcmp.eq.s32.totalorder %v27_v18, %v89_v29 }
 0x11c   :  { %v93_v33 = vsel %vm91_vm3, %v23_v1, 0.0  ;;  %140 = vpow2.f32 %v41_v38 }
 0x11d   :  { %v97_v34 = vsel %vm28_vm0, %v93_v33, 0.0  ;;  %142 = vpow2.f32 %v43_v39 }
 0x121   :  { %v137_v28 = vpop.eup %136 }
 0x122   :  { %v65_v30 = vsel %vm28_vm0, %v137_v28, 0.0 }
 0x123   :  { %66 = vadd.xlane.f32.xlu1 %v65_v30 }
 0x125   :  { %v139_v31 = vpop.eup %138 }
 0x126   :  { %v68_v32 = vsel %vm28_vm0, %v139_v31, 0.0  ;;  %v141_v40 = vpop.eup %140 }
 0x127   :  { %69 = vadd.xlane.f32.xlu1 %v68_v32  ;;  %v47_v42 = vmul.f32 %v141_v40, %v45_v41  ;;  %v143_v43 = vpop.eup %142 }
 0x128   :  { %v48_v47 = vmul.f32 %v143_v43, %v46_v45 }
 0x12b   :  { %98 = vadd.xlane.f32.xlu1 %v97_v34 }
 0x12d   :  { %v96_v36 = vpop.xlane.xlu0 %95 }
 0x12e   :  { %v100_v37 = vadd.f32 %v96_v36, %v82_v35 }
 0x130   :  { %102 = vst.msk [vmem:[#allocation4] sm:$0xff] %vm15_vm1, %v100_v37 }
 0x137   :  { %v119_v58 = vld [vmem:[#allocation4] sm:$0xff] }
 0x1b0   :  { %v67_v44 = vpop.xlane.xlu1 %66 }
 0x1b1   :  { %v71_v46 = vadd.f32 %v67_v44, %v47_v42 }
 0x1b3   :  { %74 = vst.msk [vmem:[#allocation3] sm:$0xff] %vm15_vm1, %v71_v46 }
 0x1b4   :  { %v70_v48 = vpop.xlane.xlu1 %69 }
 0x1b5   :  { %v72_v49 = vadd.f32 %v70_v48, %v48_v47 }
 0x1b7   :  { %75 = vst.msk [vmem:[#allocation3 + $0x8] sm:$0xff] %vm15_vm1, %v72_v49 }
 0x1b8   :  { %v99_v51 = vpop.xlane.xlu1 %98 }
 0x1b9   :  { %v101_v52 = vadd.f32 %v99_v51, %v83_v50 }
 0x1ba   :  { %v111_v53 = vld [vmem:[#allocation3] sm:$0xff] }
 0x1bb   :  { %144 = vlog2.f32 %v111_v53  ;;  %103 = vst.msk [vmem:[#allocation4 + $0x8] sm:$0xff] %vm15_vm1, %v101_v52 }
 0x1be   :  { %v112_v54 = vld [vmem:[#allocation3 + $0x8] sm:$0xff] }
 0x1bf   :  { %146 = vlog2.f32 %v112_v54 }
 0x1c2   :  { %v120_v2 = vld [vmem:[#allocation4 + $0x8] sm:$0xff] }
 0x1c5   :  { %v145_v55 = vpop.eup %144 }
 0x1c6   :  { %v114_v56 = vmul.f32 0.6931472, %v145_v55 }
 0x1c8   :  { %v117_v59 = vadd.f32 %v114_v56, %v109_v57 }
 0x1c9   :  { %v147_v60 = vpop.eup %146 }
 0x1ca   :  { %v116_v61 = vmul.f32 0.6931472, %v147_v60  ;;  %v121_v62 = vsub.f32 %v117_v59, %v119_v58 }
 0x1cc   :  { %v118_v0 = vadd.f32 %v116_v61, %v110_v63  ;;  %v123_v1 = vsel %vm107_vm4, %v121_v62, 0.0 }
 0x1cd   :  { %125 = vst.msk [vmem:[%s214_s2] sm:$0xff] %vm15_vm1, %v123_v1 }
 0x1ce   :  { %v122_v3 = vsub.f32 %v118_v0, %v120_v2 }
 0x1d0   :  { %v124_v4 = vsel %vm108_vm5, %v122_v3, 0.0 }
 0x1d1   :  { %126 = vst.msk [vmem:[%s214_s2 + $0x8] sm:$0xff] %vm15_vm1, %v124_v4 }

</bundles_post_ra>
